<compile_context>
chip_gen: v7x
topology: tpu7x:2x2x1
jax: 0.10.0
libtpu: 0.0.40
codegen_flags: <defaults>
</compile_context>

<pallas_src>
import functools

import jax
import jax.numpy as jnp
import numpy as np
from jax import lax
from jax.experimental import pallas as pl
from jax.experimental.pallas import tpu as pltpu


# ------------------------------ conv helpers ------------------------------

def _conv_taps(k):
    r = k // 2
    return [(dy, dx) for dy in range(-r, r + 1) for dx in range(-r, r + 1)]


def _conv_masks(H, W, k, nb):
    """(k*k, nb*H*W) f32 validity masks per tap (1 inside image, 0 at zero-pad),
    tiled across the nb images folded onto the lane axis."""
    y, x = np.meshgrid(np.arange(H), np.arange(W), indexing="ij")
    rows = []
    for dy, dx in _conv_taps(k):
        ok = (y + dy >= 0) & (y + dy < H) & (x + dx >= 0) & (x + dx < W)
        rows.append(np.tile(ok.reshape(-1), nb))
    return jnp.asarray(np.stack(rows).astype(np.float32))


def _nbytes(a):
    return int(np.prod(a.shape)) * a.dtype.itemsize


# ------------------------------ fused Pallas kernel ------------------------------

def _fused_shake_kernel(x_ref, mask_ref, s1_ref, b1_ref, w1_ref, s2_ref, b2_ref,
                        w2_ref, s3_ref, b3_ref, w3_ref, bias3_ref,
                        o_ref, patches_ref, *, W, k, C, Cm, mm_dtype):
    """Full eval-mode ResnetV2Shake, channel-major, both branches block-diag-merged.

    x_ref / o_ref : (C, L)  with L = NB*H*W on the 128-wide lane axis.
    mask_ref      : (k*k, L) per-tap boundary masks.
    patches_ref   : VMEM scratch (k*k*2Cm, L), dtype = matmul dtype.
    """
    L = x_ref.shape[-1]
    C2, Cm2 = 2 * C, 2 * Cm
    taps = _conv_taps(k)

    x = x_ref[...]                                                   # (C, L) f32

    # conv1: BN -> ReLU per branch, stacked along K -> one block-diag 1x1 matmul.
    z1 = jnp.concatenate(
        [jnp.maximum(x * s1_ref[0] + b1_ref[0], 0.0),
         jnp.maximum(x * s1_ref[1] + b1_ref[1], 0.0)], axis=0)       # (2C, L)
    m1 = jnp.dot(w1_ref[...], z1.astype(mm_dtype),
                 preferred_element_type=jnp.float32)                 # (2Cm, L)

    # conv2: BN -> ReLU -> kxk conv as one im2col matmul (K = k*k*2Cm).
    z2 = jnp.maximum(m1 * s2_ref[...] + b2_ref[...], 0.0)            # (2Cm, L)
    for t, (dy, dx) in enumerate(taps):
        d = dy * W + dx
        if d == 0:                      # centre tap: no roll, mask is all-ones
            shifted = z2
        else:                           # zero pad (and image boundaries) via mask
            shifted = pltpu.roll(z2, shift=(-d) % L, axis=1) * mask_ref[pl.ds(t, 1), :]
        patches_ref[pl.ds(t * Cm2, Cm2), :] = shifted.astype(mm_dtype)
    c2 = jnp.dot(w2_ref[...], patches_ref[...],
                 preferred_element_type=jnp.float32)                 # (2Cm, L)

    # conv3: BN -> ReLU -> block-diag 1x1 matmul + bias.
    z3 = jnp.maximum(c2 * s3_ref[...] + b3_ref[...], 0.0)
    f = jnp.dot(w3_ref[...], z3.astype(mm_dtype),
                preferred_element_type=jnp.float32) + bias3_ref[...]  # (2C, L)

    # eval: alpha = 0.5 -> out = x + 0.5*((x + 0.5*fA) + (x + 0.5*fB))
    #                          = 2*x + 0.25*(fA + fB)
    o_ref[...] = 2.0 * x + 0.25 * (f[0:C] + f[C:C2])


# ------------------------------ parameter packing ------------------------------

def _pack_params(pA, pB, mm_dtype):
    """Merge blockA/blockB params into block-diagonal, channel-major kernel layouts."""
    C, Cm = pA["w1"].shape
    k = pA["w2"].shape[0]
    f32 = jnp.float32

    def per_branch_col(name):                       # (2, n, 1) f32
        return jnp.stack([pA[name], pB[name]]).astype(f32)[:, :, None]

    def stacked_col(name):                          # (2n, 1) f32
        return jnp.concatenate([pA[name], pB[name]]).astype(f32)[:, None]

    def block_diag(a, b):                           # (m,n),(m,n) -> (2m,2n)
        z = jnp.zeros(a.shape, f32)
        return jnp.concatenate([jnp.concatenate([a, z], axis=1),
                                jnp.concatenate([z, b], axis=1)], axis=0)

    s1, b1 = per_branch_col("s1"), per_branch_col("b1")
    s2, b2 = stacked_col("s2"), stacked_col("b2")
    s3, b3 = stacked_col("s3"), stacked_col("b3")
    bias3 = stacked_col("bias3")

    w1bd = block_diag(pA["w1"].T, pB["w1"].T).astype(mm_dtype)       # (2Cm, 2C)
    w3bd = block_diag(pA["w3"].T, pB["w3"].T).astype(mm_dtype)       # (2C, 2Cm)
    wa = pA["w2"].reshape(k * k, Cm, Cm)                             # (tap, in, out)
    wb = pB["w2"].reshape(k * k, Cm, Cm)
    w2bd = jnp.concatenate([block_diag(wa[t].T, wb[t].T) for t in range(k * k)],
                           axis=1).astype(mm_dtype)                  # (2Cm, k*k*2Cm)
    return [s1, b1, w1bd, s2, b2, w2bd, s3, b3, w3bd, bias3]


# ------------------------------ public wrapper ------------------------------

def resnet_v2_shake_pallas(x_nchw, pA, pB, *, matmul_dtype=jnp.bfloat16,
                           images_per_block=None):
    N, C, H, W = x_nchw.shape
    HW = H * W
    k = pA["w2"].shape[0]
    Cm = pA["w1"].shape[1]

    nb = N if images_per_block is None else images_per_block
    assert N % nb == 0, "images_per_block must divide the batch"
    Lb = nb * HW
    # TODO(synk): on v7x (2 TensorCores) with small batches, images_per_block=N//2
    #             keeps the "parallel" grid axis >= 2; at these shapes folding wins.

    # Channel-major layout: (C, N*HW), batch folded onto the 128-wide lane axis.
    x_cm = jnp.transpose(x_nchw.reshape(N, C, HW).astype(jnp.float32),
                         (1, 0, 2)).reshape(C, N * HW)
    masks = _conv_masks(H, W, k, nb)                                 # (k*k, Lb) f32
    aux = [masks] + _pack_params(pA, pB, matmul_dtype)

    kernel = functools.partial(_fused_shake_kernel, W=W, k=k, C=C, Cm=Cm,
                               mm_dtype=matmul_dtype)

    def _aux_spec(a):
        nd = a.ndim
        idx = lambda g, _nd=nd: (0,) * _nd
        if _nbytes(a) >= (1 << 20):
            # Grid-invariant weights: single-buffer so large-Cm w2 is not
            # double-buffered into v7x's 64 MiB VMEM.
            return pl.BlockSpec(a.shape, idx, pipeline_mode=pl.Buffered(1))
        return pl.BlockSpec(a.shape, idx)

    in_specs = [pl.BlockSpec((C, Lb), lambda g: (0, g))]
    in_specs += [_aux_spec(a) for a in aux]

    flops = 2 * 2 * N * HW * (C * Cm + k * k * Cm * Cm + Cm * C)
    bytes_accessed = 2 * _nbytes(x_cm) + sum(_nbytes(a) for a in aux)
    cost = pl.CostEstimate(flops=flops, transcendentals=0,
                           bytes_accessed=bytes_accessed)

    out_cm = pl.pallas_call(
        kernel,
        out_shape=jax.ShapeDtypeStruct((C, N * HW), jnp.float32),
        grid=(N // nb,),
        in_specs=in_specs,
        out_specs=pl.BlockSpec((C, Lb), lambda g: (0, g)),
        scratch_shapes=[pltpu.VMEM((k * k * 2 * Cm, Lb), matmul_dtype)],
        compiler_params=pltpu.CompilerParams(dimension_semantics=("parallel",)),
        cost_estimate=cost,
    )(x_cm, *aux)

    return out_cm.reshape(C, N, HW).transpose(1, 0, 2).reshape(N, C, H, W)


# ------------------------------ synthetic params ------------------------------

def init_block_params(key, C, f=2, k=3):
    """Deterministic synthetic parameters for one ShakeBlock (eval-mode BN folded)."""
    Cm = int(C * f)
    ks = jax.random.split(key, 16)
    eps = 1e-5

    def bn(kg, kb, km, kv, n):
        gamma = jax.random.uniform(kg, (n,), jnp.float32, 0.5, 1.5)
        beta = 0.1 * jax.random.normal(kb, (n,), jnp.float32)
        mean = 0.1 * jax.random.normal(km, (n,), jnp.float32)
        var = jax.random.uniform(kv, (n,), jnp.float32, 0.5, 1.5)
        scale = gamma / jnp.sqrt(var + eps)
        shift = beta - mean * scale
        return scale, shift

    s1, b1 = bn(ks[0], ks[1], ks[2], ks[3], C)      # bn of conv1 (in = C)
    s2, b2 = bn(ks[4], ks[5], ks[6], ks[7], Cm)     # bn of conv2 (in = Cm)
    s3, b3 = bn(ks[8], ks[9], ks[10], ks[11], Cm)   # bn of conv3 (in = Cm)
    w1 = 0.2 * jax.random.normal(ks[12], (C, Cm), jnp.float32)          # 1x1, no bias
    w2 = 0.2 * jax.random.normal(ks[13], (k, k, Cm, Cm), jnp.float32)   # kxk HWIO, no bias
    w3 = 0.2 * jax.random.normal(ks[14], (Cm, C), jnp.float32)          # 1x1, with bias
    bias3 = 0.1 * jax.random.normal(ks[15], (C,), jnp.float32)
    return dict(s1=s1, b1=b1, w1=w1, s2=s2, b2=b2, w2=w2,
                s3=s3, b3=b3, w3=w3, bias3=bias3)


# ------------------------------ pure-JAX reference ------------------------------

def _ref_branch(x, p):
    z = jnp.maximum(x * p["s1"] + p["b1"], 0.0)
    z = jnp.einsum("nhwc,cd->nhwd", z, p["w1"])
    z = jnp.maximum(z * p["s2"] + p["b2"], 0.0)
    z = lax.conv_general_dilated(z, p["w2"], (1, 1), "SAME",
                                 dimension_numbers=("NHWC", "HWIO", "NHWC"))
    z = jnp.maximum(z * p["s3"] + p["b3"], 0.0)
    z = jnp.einsum("nhwc,cd->nhwd", z, p["w3"]) + p["bias3"]
    return z


def resnet_v2_shake_ref(x_nchw, pA, pB):
    x = jnp.transpose(x_nchw, (0, 2, 3, 1))
    xA = x + 0.5 * _ref_branch(x, pA)
    xB = x + 0.5 * _ref_branch(x, pB)
    out = x + 0.5 * (xA + xB)
    return jnp.transpose(out, (0, 3, 1, 2))


# ------------------------------ main ------------------------------

if __name__ == "__main__":
    key = jax.random.PRNGKey(0)
    kx, kA, kB = jax.random.split(key, 3)
    N, C, H, W = 2, 4, 16, 16                        # NCHW, matches nn.Module input
    x = jax.random.normal(kx, (N, C, H, W), jnp.float32)
    pA = init_block_params(kA, C, f=2, k=3)
    pB = init_block_params(kB, C, f=2, k=3)

    ref = resnet_v2_shake_ref(x, pA, pB)

    # Exact-structure check: f32 MXU operands -> tight tolerance.
    f32_fn = jax.jit(functools.partial(resnet_v2_shake_pallas,
                                       matmul_dtype=jnp.float32))
    out_f32 = jax.block_until_ready(f32_fn(x, pA, pB))
    np.testing.assert_allclose(np.asarray(out_f32), np.asarray(ref),
                               rtol=1e-4, atol=1e-4)

    # Default fast path: bf16 MXU operands, f32 accumulation -> looser tolerance.
    out = jax.block_until_ready(jax.jit(resnet_v2_shake_pallas)(x, pA, pB))
    assert out.shape == (N, C, H, W) and out.dtype == jnp.float32
    np.testing.assert_allclose(np.asarray(out), np.asarray(ref),
                               rtol=2e-2, atol=2e-2)
    print("KERNEL_OK")
</pallas_src>

<mosaic_0001>
module attributes {stable_mosaic.version = 11 : i64} {
  func.func @_fused_shake_kernel(%arg0: i32, %arg1: memref<4x512xf32, #tpu.memory_space<vmem>>, %arg2: memref<9x512xf32, #tpu.memory_space<vmem>>, %arg3: memref<2x4x1xf32, #tpu.memory_space<vmem>>, %arg4: memref<2x4x1xf32, #tpu.memory_space<vmem>>, %arg5: memref<16x8xf32, #tpu.memory_space<vmem>>, %arg6: memref<16x1xf32, #tpu.memory_space<vmem>>, %arg7: memref<16x1xf32, #tpu.memory_space<vmem>>, %arg8: memref<16x144xf32, #tpu.memory_space<vmem>>, %arg9: memref<16x1xf32, #tpu.memory_space<vmem>>, %arg10: memref<16x1xf32, #tpu.memory_space<vmem>>, %arg11: memref<8x16xf32, #tpu.memory_space<vmem>>, %arg12: memref<8x1xf32, #tpu.memory_space<vmem>>, %arg13: memref<4x512xf32, #tpu.memory_space<vmem>>, %arg14: memref<144x512xf32, #tpu.memory_space<vmem>>) attributes {dimension_semantics = [#tpu.dimension_semantics<parallel>], iteration_bounds = array<i64: 1>, scalar_prefetch = 0 : i64, scratch_operands = 1 : i64, tpu.core_type = #tpu.core_type<tc>, window_params = [{transform_indices = @transform_0, window_bounds = array<i64: 4, 512>}, {pipeline_mode = #tpu.pipeline_mode<synchronous>, transform_indices = @transform_1, window_bounds = array<i64: 9, 512>}, {pipeline_mode = #tpu.pipeline_mode<synchronous>, transform_indices = @transform_2, window_bounds = array<i64: 2, 4, 1>}, {pipeline_mode = #tpu.pipeline_mode<synchronous>, transform_indices = @transform_3, window_bounds = array<i64: 2, 4, 1>}, {pipeline_mode = #tpu.pipeline_mode<synchronous>, transform_indices = @transform_4, window_bounds = array<i64: 16, 8>}, {pipeline_mode = #tpu.pipeline_mode<synchronous>, transform_indices = @transform_5, window_bounds = array<i64: 16, 1>}, {pipeline_mode = #tpu.pipeline_mode<synchronous>, transform_indices = @transform_6, window_bounds = array<i64: 16, 1>}, {pipeline_mode = #tpu.pipeline_mode<synchronous>, transform_indices = @transform_7, window_bounds = array<i64: 16, 144>}, {pipeline_mode = #tpu.pipeline_mode<synchronous>, transform_indices = @transform_8, window_bounds = array<i64: 16, 1>}, {pipeline_mode = #tpu.pipeline_mode<synchronous>, transform_indices = @transform_9, window_bounds = array<i64: 16, 1>}, {pipeline_mode = #tpu.pipeline_mode<synchronous>, transform_indices = @transform_10, window_bounds = array<i64: 8, 16>}, {pipeline_mode = #tpu.pipeline_mode<synchronous>, transform_indices = @transform_11, window_bounds = array<i64: 8, 1>}, {transform_indices = @transform_12, window_bounds = array<i64: 4, 512>}]} {
    %c0 = arith.constant 0 : index
    %c0_0 = arith.constant 0 : index
    %0 = vector.load %arg1[%c0, %c0_0] : memref<4x512xf32, #tpu.memory_space<vmem>>, vector<4x512xf32>
    %c0_1 = arith.constant 0 : index
    %c0_2 = arith.constant 0 : index
    %c0_3 = arith.constant 0 : index
    %1 = vector.load %arg3[%c0_1, %c0_2, %c0_3] : memref<2x4x1xf32, #tpu.memory_space<vmem>>, vector<1x4x1xf32>
    %2 = vector.shape_cast %1 : vector<1x4x1xf32> to vector<4x1xf32>
    %3 = vector.broadcast %2 : vector<4x1xf32> to vector<4x512xf32>
    %4 = arith.mulf %0, %3 : vector<4x512xf32>
    %c0_4 = arith.constant 0 : index
    %c0_5 = arith.constant 0 : index
    %c0_6 = arith.constant 0 : index
    %5 = vector.load %arg4[%c0_4, %c0_5, %c0_6] : memref<2x4x1xf32, #tpu.memory_space<vmem>>, vector<1x4x1xf32>
    %6 = vector.shape_cast %5 : vector<1x4x1xf32> to vector<4x1xf32>
    %7 = vector.broadcast %6 : vector<4x1xf32> to vector<4x512xf32>
    %8 = arith.addf %4, %7 : vector<4x512xf32>
    %cst = arith.constant 0.000000e+00 : f32
    %9 = vector.broadcast %cst : f32 to vector<4x512xf32>
    %10 = arith.maximumf %8, %9 : vector<4x512xf32>
    %c1 = arith.constant 1 : index
    %c0_7 = arith.constant 0 : index
    %c0_8 = arith.constant 0 : index
    %11 = vector.load %arg3[%c1, %c0_7, %c0_8] : memref<2x4x1xf32, #tpu.memory_space<vmem>>, vector<1x4x1xf32>
    %12 = vector.shape_cast %11 : vector<1x4x1xf32> to vector<4x1xf32>
    %13 = vector.broadcast %12 : vector<4x1xf32> to vector<4x512xf32>
    %14 = arith.mulf %0, %13 : vector<4x512xf32>
    %c1_9 = arith.constant 1 : index
    %c0_10 = arith.constant 0 : index
    %c0_11 = arith.constant 0 : index
    %15 = vector.load %arg4[%c1_9, %c0_10, %c0_11] : memref<2x4x1xf32, #tpu.memory_space<vmem>>, vector<1x4x1xf32>
    %16 = vector.shape_cast %15 : vector<1x4x1xf32> to vector<4x1xf32>
    %17 = vector.broadcast %16 : vector<4x1xf32> to vector<4x512xf32>
    %18 = arith.addf %14, %17 : vector<4x512xf32>
    %cst_12 = arith.constant 0.000000e+00 : f32
    %19 = vector.broadcast %cst_12 : f32 to vector<4x512xf32>
    %20 = arith.maximumf %18, %19 : vector<4x512xf32>
    %21 = tpu.concatenate %10, %20 in 0 : vector<4x512xf32>, vector<4x512xf32> -> vector<8x512xf32>
    %c0_13 = arith.constant 0 : index
    %c0_14 = arith.constant 0 : index
    %22 = vector.load %arg5[%c0_13, %c0_14] : memref<16x8xf32, #tpu.memory_space<vmem>>, vector<16x8xf32>
    %cst_15 = arith.constant dense<0.000000e+00> : vector<16x512xf32>
    %23 = tpu.matmul %22, %21, %cst_15 {dimension_numbers = #tpu.dot_dimension_numbers<[1], [0], [0], [1], [0, 0, 1, 1], [], []>} : vector<16x8xf32>, vector<8x512xf32>, vector<16x512xf32> -> vector<16x512xf32>
    %c0_16 = arith.constant 0 : index
    %c0_17 = arith.constant 0 : index
    %24 = vector.load %arg6[%c0_16, %c0_17] : memref<16x1xf32, #tpu.memory_space<vmem>>, vector<16x1xf32>
    %25 = vector.broadcast %24 : vector<16x1xf32> to vector<16x512xf32>
    %26 = arith.mulf %23, %25 : vector<16x512xf32>
    %c0_18 = arith.constant 0 : index
    %c0_19 = arith.constant 0 : index
    %27 = vector.load %arg7[%c0_18, %c0_19] : memref<16x1xf32, #tpu.memory_space<vmem>>, vector<16x1xf32>
    %28 = vector.broadcast %27 : vector<16x1xf32> to vector<16x512xf32>
    %29 = arith.addf %26, %28 : vector<16x512xf32>
    %cst_20 = arith.constant 0.000000e+00 : f32
    %30 = vector.broadcast %cst_20 : f32 to vector<16x512xf32>
    %31 = arith.maximumf %29, %30 : vector<16x512xf32>
    %c17_i32 = arith.constant 17 : i32
    %32 = tpu.dynamic_rotate %31 by %c17_i32 dim 1 : vector<16x512xf32>, i32 -> vector<16x512xf32>
    %c0_21 = arith.constant 0 : index
    %c0_22 = arith.constant 0 : index
    %33 = vector.load %arg2[%c0_21, %c0_22] : memref<9x512xf32, #tpu.memory_space<vmem>>, vector<1x512xf32>
    %34 = vector.broadcast %33 : vector<1x512xf32> to vector<16x512xf32>
    %35 = arith.mulf %32, %34 : vector<16x512xf32>
    %c0_23 = arith.constant 0 : index
    %c0_24 = arith.constant 0 : index
    %36 = vector.load %arg14[%c0_23, %c0_24] : memref<144x512xf32, #tpu.memory_space<vmem>>, vector<16x512xf32>
    tpu.vector_store %arg14[%c0_23, %c0_24], %35 {strides = array<i32>} : memref<144x512xf32, #tpu.memory_space<vmem>>, vector<16x512xf32>,
    %c16_i32 = arith.constant 16 : i32
    %37 = tpu.dynamic_rotate %31 by %c16_i32 dim 1 : vector<16x512xf32>, i32 -> vector<16x512xf32>
    %c1_25 = arith.constant 1 : index
    %c0_26 = arith.constant 0 : index
    %38 = vector.load %arg2[%c1_25, %c0_26] : memref<9x512xf32, #tpu.memory_space<vmem>>, vector<1x512xf32>
    %39 = vector.broadcast %38 : vector<1x512xf32> to vector<16x512xf32>
    %40 = arith.mulf %37, %39 : vector<16x512xf32>
    %c16 = arith.constant 16 : index
    %c0_27 = arith.constant 0 : index
    %41 = vector.load %arg14[%c16, %c0_27] : memref<144x512xf32, #tpu.memory_space<vmem>>, vector<16x512xf32>
    tpu.vector_store %arg14[%c16, %c0_27], %40 {strides = array<i32>} : memref<144x512xf32, #tpu.memory_space<vmem>>, vector<16x512xf32>,
    %c15_i32 = arith.constant 15 : i32
    %42 = tpu.dynamic_rotate %31 by %c15_i32 dim 1 : vector<16x512xf32>, i32 -> vector<16x512xf32>
    %c2 = arith.constant 2 : index
    %c0_28 = arith.constant 0 : index
    %43 = vector.load %arg2[%c2, %c0_28] : memref<9x512xf32, #tpu.memory_space<vmem>>, vector<1x512xf32>
    %44 = vector.broadcast %43 : vector<1x512xf32> to vector<16x512xf32>
    %45 = arith.mulf %42, %44 : vector<16x512xf32>
    %c32 = arith.constant 32 : index
    %c0_29 = arith.constant 0 : index
    %46 = vector.load %arg14[%c32, %c0_29] : memref<144x512xf32, #tpu.memory_space<vmem>>, vector<16x512xf32>
    tpu.vector_store %arg14[%c32, %c0_29], %45 {strides = array<i32>} : memref<144x512xf32, #tpu.memory_space<vmem>>, vector<16x512xf32>,
    %c1_i32 = arith.constant 1 : i32
    %47 = tpu.dynamic_rotate %31 by %c1_i32 dim 1 : vector<16x512xf32>, i32 -> vector<16x512xf32>
    %c3 = arith.constant 3 : index
    %c0_30 = arith.constant 0 : index
    %48 = vector.load %arg2[%c3, %c0_30] : memref<9x512xf32, #tpu.memory_space<vmem>>, vector<1x512xf32>
    %49 = vector.broadcast %48 : vector<1x512xf32> to vector<16x512xf32>
    %50 = arith.mulf %47, %49 : vector<16x512xf32>
    %c48 = arith.constant 48 : index
    %c0_31 = arith.constant 0 : index
    %51 = vector.load %arg14[%c48, %c0_31] : memref<144x512xf32, #tpu.memory_space<vmem>>, vector<16x512xf32>
    tpu.vector_store %arg14[%c48, %c0_31], %50 {strides = array<i32>} : memref<144x512xf32, #tpu.memory_space<vmem>>, vector<16x512xf32>,
    %c64 = arith.constant 64 : index
    %c0_32 = arith.constant 0 : index
    %52 = vector.load %arg14[%c64, %c0_32] : memref<144x512xf32, #tpu.memory_space<vmem>>, vector<16x512xf32>
    tpu.vector_store %arg14[%c64, %c0_32], %31 {strides = array<i32>} : memref<144x512xf32, #tpu.memory_space<vmem>>, vector<16x512xf32>,
    %c511_i32 = arith.constant 511 : i32
    %53 = tpu.dynamic_rotate %31 by %c511_i32 dim 1 : vector<16x512xf32>, i32 -> vector<16x512xf32>
    %c5 = arith.constant 5 : index
    %c0_33 = arith.constant 0 : index
    %54 = vector.load %arg2[%c5, %c0_33] : memref<9x512xf32, #tpu.memory_space<vmem>>, vector<1x512xf32>
    %55 = vector.broadcast %54 : vector<1x512xf32> to vector<16x512xf32>
    %56 = arith.mulf %53, %55 : vector<16x512xf32>
    %c80 = arith.constant 80 : index
    %c0_34 = arith.constant 0 : index
    %57 = vector.load %arg14[%c80, %c0_34] : memref<144x512xf32, #tpu.memory_space<vmem>>, vector<16x512xf32>
    tpu.vector_store %arg14[%c80, %c0_34], %56 {strides = array<i32>} : memref<144x512xf32, #tpu.memory_space<vmem>>, vector<16x512xf32>,
    %c497_i32 = arith.constant 497 : i32
    %58 = tpu.dynamic_rotate %31 by %c497_i32 dim 1 : vector<16x512xf32>, i32 -> vector<16x512xf32>
    %c6 = arith.constant 6 : index
    %c0_35 = arith.constant 0 : index
    %59 = vector.load %arg2[%c6, %c0_35] : memref<9x512xf32, #tpu.memory_space<vmem>>, vector<1x512xf32>
    %60 = vector.broadcast %59 : vector<1x512xf32> to vector<16x512xf32>
    %61 = arith.mulf %58, %60 : vector<16x512xf32>
    %c96 = arith.constant 96 : index
    %c0_36 = arith.constant 0 : index
    %62 = vector.load %arg14[%c96, %c0_36] : memref<144x512xf32, #tpu.memory_space<vmem>>, vector<16x512xf32>
    tpu.vector_store %arg14[%c96, %c0_36], %61 {strides = array<i32>} : memref<144x512xf32, #tpu.memory_space<vmem>>, vector<16x512xf32>,
    %c496_i32 = arith.constant 496 : i32
    %63 = tpu.dynamic_rotate %31 by %c496_i32 dim 1 : vector<16x512xf32>, i32 -> vector<16x512xf32>
    %c7 = arith.constant 7 : index
    %c0_37 = arith.constant 0 : index
    %64 = vector.load %arg2[%c7, %c0_37] : memref<9x512xf32, #tpu.memory_space<vmem>>, vector<1x512xf32>
    %65 = vector.broadcast %64 : vector<1x512xf32> to vector<16x512xf32>
    %66 = arith.mulf %63, %65 : vector<16x512xf32>
    %c112 = arith.constant 112 : index
    %c0_38 = arith.constant 0 : index
    %67 = vector.load %arg14[%c112, %c0_38] : memref<144x512xf32, #tpu.memory_space<vmem>>, vector<16x512xf32>
    tpu.vector_store %arg14[%c112, %c0_38], %66 {strides = array<i32>} : memref<144x512xf32, #tpu.memory_space<vmem>>, vector<16x512xf32>,
    %c495_i32 = arith.constant 495 : i32
    %68 = tpu.dynamic_rotate %31 by %c495_i32 dim 1 : vector<16x512xf32>, i32 -> vector<16x512xf32>
    %c8 = arith.constant 8 : index
    %c0_39 = arith.constant 0 : index
    %69 = vector.load %arg2[%c8, %c0_39] : memref<9x512xf32, #tpu.memory_space<vmem>>, vector<1x512xf32>
    %70 = vector.broadcast %69 : vector<1x512xf32> to vector<16x512xf32>
    %71 = arith.mulf %68, %70 : vector<16x512xf32>
    %c128 = arith.constant 128 : index
    %c0_40 = arith.constant 0 : index
    %72 = vector.load %arg14[%c128, %c0_40] : memref<144x512xf32, #tpu.memory_space<vmem>>, vector<16x512xf32>
    tpu.vector_store %arg14[%c128, %c0_40], %71 {strides = array<i32>} : memref<144x512xf32, #tpu.memory_space<vmem>>, vector<16x512xf32>,
    %c0_41 = arith.constant 0 : index
    %c0_42 = arith.constant 0 : index
    %73 = vector.load %arg8[%c0_41, %c0_42] : memref<16x144xf32, #tpu.memory_space<vmem>>, vector<16x144xf32>
    %c0_43 = arith.constant 0 : index
    %c0_44 = arith.constant 0 : index
    %74 = vector.load %arg14[%c0_43, %c0_44] : memref<144x512xf32, #tpu.memory_space<vmem>>, vector<144x512xf32>
    %cst_45 = arith.constant dense<0.000000e+00> : vector<16x512xf32>
    %75 = tpu.matmul %73, %74, %cst_45 {dimension_numbers = #tpu.dot_dimension_numbers<[1], [0], [0], [1], [0, 0, 1, 1], [], []>} : vector<16x144xf32>, vector<144x512xf32>, vector<16x512xf32> -> vector<16x512xf32>
    %c0_46 = arith.constant 0 : index
    %c0_47 = arith.constant 0 : index
    %76 = vector.load %arg9[%c0_46, %c0_47] : memref<16x1xf32, #tpu.memory_space<vmem>>, vector<16x1xf32>
    %77 = vector.broadcast %76 : vector<16x1xf32> to vector<16x512xf32>
    %78 = arith.mulf %75, %77 : vector<16x512xf32>
    %c0_48 = arith.constant 0 : index
    %c0_49 = arith.constant 0 : index
    %79 = vector.load %arg10[%c0_48, %c0_49] : memref<16x1xf32, #tpu.memory_space<vmem>>, vector<16x1xf32>
    %80 = vector.broadcast %79 : vector<16x1xf32> to vector<16x512xf32>
    %81 = arith.addf %78, %80 : vector<16x512xf32>
    %cst_50 = arith.constant 0.000000e+00 : f32
    %82 = vector.broadcast %cst_50 : f32 to vector<16x512xf32>
    %83 = arith.maximumf %81, %82 : vector<16x512xf32>
    %c0_51 = arith.constant 0 : index
    %c0_52 = arith.constant 0 : index
    %84 = vector.load %arg11[%c0_51, %c0_52] : memref<8x16xf32, #tpu.memory_space<vmem>>, vector<8x16xf32>
    %cst_53 = arith.constant dense<0.000000e+00> : vector<8x512xf32>
    %85 = tpu.matmul %84, %83, %cst_53 {dimension_numbers = #tpu.dot_dimension_numbers<[1], [0], [0], [1], [0, 0, 1, 1], [], []>} : vector<8x16xf32>, vector<16x512xf32>, vector<8x512xf32> -> vector<8x512xf32>
    %c0_54 = arith.constant 0 : index
    %c0_55 = arith.constant 0 : index
    %86 = vector.load %arg12[%c0_54, %c0_55] : memref<8x1xf32, #tpu.memory_space<vmem>>, vector<8x1xf32>
    %87 = vector.broadcast %86 : vector<8x1xf32> to vector<8x512xf32>
    %88 = arith.addf %85, %87 : vector<8x512xf32>
    %cst_56 = arith.constant 2.000000e+00 : f32
    %89 = vector.broadcast %cst_56 : f32 to vector<4x512xf32>
    %90 = arith.mulf %89, %0 : vector<4x512xf32>
    %91 = vector.extract_strided_slice %88 {offsets = [0, 0], sizes = [4, 512], strides = [1, 1]} : vector<8x512xf32> to vector<4x512xf32>
    %92 = vector.extract_strided_slice %88 {offsets = [4, 0], sizes = [4, 512], strides = [1, 1]} : vector<8x512xf32> to vector<4x512xf32>
    %93 = arith.addf %91, %92 : vector<4x512xf32>
    %cst_57 = arith.constant 2.500000e-01 : f32
    %94 = vector.broadcast %cst_57 : f32 to vector<4x512xf32>
    %95 = arith.mulf %94, %93 : vector<4x512xf32>
    %96 = arith.addf %90, %95 : vector<4x512xf32>
    %c0_58 = arith.constant 0 : index
    %c0_59 = arith.constant 0 : index
    %97 = vector.load %arg13[%c0_58, %c0_59] : memref<4x512xf32, #tpu.memory_space<vmem>>, vector<4x512xf32>
    tpu.vector_store %arg13[%c0_58, %c0_59], %96 {strides = array<i32>} : memref<4x512xf32, #tpu.memory_space<vmem>>, vector<4x512xf32>,
    return
  }
  func.func @transform_0(%arg0: i32) -> (i32, i32) {
    %c0_i32 = arith.constant 0 : i32
    %c0_i32_0 = arith.constant 0 : i32
    return %c0_i32, %arg0 : i32, i32
  }
  func.func @transform_1(%arg0: i32) -> (i32, i32) {
    %c0_i32 = arith.constant 0 : i32
    %c0_i32_0 = arith.constant 0 : i32
    %c0_i32_1 = arith.constant 0 : i32
    return %c0_i32, %c0_i32_0 : i32, i32
  }
  func.func @transform_2(%arg0: i32) -> (i32, i32, i32) {
    %c0_i32 = arith.constant 0 : i32
    %c0_i32_0 = arith.constant 0 : i32
    %c0_i32_1 = arith.constant 0 : i32
    %c0_i32_2 = arith.constant 0 : i32
    return %c0_i32, %c0_i32_0, %c0_i32_1 : i32, i32, i32
  }
  func.func @transform_3(%arg0: i32) -> (i32, i32, i32) {
    %c0_i32 = arith.constant 0 : i32
    %c0_i32_0 = arith.constant 0 : i32
    %c0_i32_1 = arith.constant 0 : i32
    %c0_i32_2 = arith.constant 0 : i32
    return %c0_i32, %c0_i32_0, %c0_i32_1 : i32, i32, i32
  }
  func.func @transform_4(%arg0: i32) -> (i32, i32) {
    %c0_i32 = arith.constant 0 : i32
    %c0_i32_0 = arith.constant 0 : i32
    %c0_i32_1 = arith.constant 0 : i32
    return %c0_i32, %c0_i32_0 : i32, i32
  }
  func.func @transform_5(%arg0: i32) -> (i32, i32) {
    %c0_i32 = arith.constant 0 : i32
    %c0_i32_0 = arith.constant 0 : i32
    %c0_i32_1 = arith.constant 0 : i32
    return %c0_i32, %c0_i32_0 : i32, i32
  }
  func.func @transform_6(%arg0: i32) -> (i32, i32) {
    %c0_i32 = arith.constant 0 : i32
    %c0_i32_0 = arith.constant 0 : i32
    %c0_i32_1 = arith.constant 0 : i32
    return %c0_i32, %c0_i32_0 : i32, i32
  }
  func.func @transform_7(%arg0: i32) -> (i32, i32) {
    %c0_i32 = arith.constant 0 : i32
    %c0_i32_0 = arith.constant 0 : i32
    %c0_i32_1 = arith.constant 0 : i32
    return %c0_i32, %c0_i32_0 : i32, i32
  }
  func.func @transform_8(%arg0: i32) -> (i32, i32) {
    %c0_i32 = arith.constant 0 : i32
    %c0_i32_0 = arith.constant 0 : i32
    %c0_i32_1 = arith.constant 0 : i32
    return %c0_i32, %c0_i32_0 : i32, i32
  }
  func.func @transform_9(%arg0: i32) -> (i32, i32) {
    %c0_i32 = arith.constant 0 : i32
    %c0_i32_0 = arith.constant 0 : i32
    %c0_i32_1 = arith.constant 0 : i32
    return %c0_i32, %c0_i32_0 : i32, i32
  }
  func.func @transform_10(%arg0: i32) -> (i32, i32) {
    %c0_i32 = arith.constant 0 : i32
    %c0_i32_0 = arith.constant 0 : i32
    %c0_i32_1 = arith.constant 0 : i32
    return %c0_i32, %c0_i32_0 : i32, i32
  }
  func.func @transform_11(%arg0: i32) -> (i32, i32) {
    %c0_i32 = arith.constant 0 : i32
    %c0_i32_0 = arith.constant 0 : i32
    %c0_i32_1 = arith.constant 0 : i32
    return %c0_i32, %c0_i32_0 : i32, i32
  }
  func.func @transform_12(%arg0: i32) -> (i32, i32) {
    %c0_i32 = arith.constant 0 : i32
    %c0_i32_0 = arith.constant 0 : i32
    return %c0_i32, %arg0 : i32, i32
  }
}

</mosaic_0001>

<bundles_post_ra>
// kernel: resnet_v2_shake_pallas.1
= control target key start
LH: loop header
LB: loop body
LE: loop exit
PB: predicated region body
PF: predicated region fallthrough
CT: control target
= control target key end

     0   :  { %v1447_v0 = vmov 0   ;;  %v2135_v9 = vmov 0.0   ;;  %v1449_v10 = vmov 839922192   ;;  %v51_v12 = vlaneseq  ;;  %s1451_s23 = smov 16   ;;  %s1452_s24 = smov 15   ;;  %s2122_s3 = inlined_call_operand.vmem [shape: f32[2,4,1], index: 3, kind: input, shape index: {}]   ;;  %s2123_s2 = inlined_call_operand.vmem [shape: f32[2,4,1], index: 2, kind: input, shape index: {}]   ;;  %s2124_s5 = inlined_call_operand.vmem [shape: f32[16,1], index: 5, kind: input, shape index: {}]   ;;  %s2125_s6 = inlined_call_operand.vmem [shape: f32[16,1], index: 6, kind: input, shape index: {}]   ;;  %s2126_s0 = inlined_call_operand.vmem [shape: f32[4,512], index: 0, kind: input, shape index: {}]   ;;  %s2127_s4 = inlined_call_operand.vmem [shape: f32[16,8], index: 4, kind: input, shape index: {}]   ;;  %s2128_s7 = inlined_call_operand.vmem [shape: f32[16,144], index: 7, kind: input, shape index: {}]   ;;  %s2129_s8 = inlined_call_operand.vmem [shape: f32[16,1], index: 8, kind: input, shape index: {}]   ;;  %s2130_s9 = inlined_call_operand.vmem [shape: f32[16,1], index: 9, kind: input, shape index: {}]   ;;  %s2131_s11 = inlined_call_operand.vmem [shape: f32[8,1], index: 11, kind: input, shape index: {}]   ;;  %s2132_s1 = inlined_call_operand.vmem [shape: f32[9,512], index: 1, kind: input, shape index: {}]   ;;  %s2133_s10 = inlined_call_operand.vmem [shape: f32[8,16], index: 10, kind: input, shape index: {}]   ;;  %s2134_s12 = inlined_call_operand.vmem [shape: f32[4,512], index: 12, kind: output, shape index: {}]  }
   0x1   :  { %1444 = vset.pattern.permute.xlu1 %v1447_v0  ;;  %1443 = vset.pattern.permute.xlu0 %v1447_v0  ;;  %v58_v1 = vld [vmem:[%s2122_s3] sm:$0xf]  ;;  %v1334_v3 = vld [vmem:[%s2122_s3 + $0x4] sm:$0xf]  ;;  %v290_v5 = vld [vmem:[%s2124_s5 + $0x8] sm:$0xff]  ;;  %v49_v11 = vunpack.c.l.s4 %v1449_v10  ;;  %vm121_vm0 = vcmask 1043456  }
   0x2   :  { %v43_v2 = vld [vmem:[%s2123_s2] sm:$0xf]  ;;  %61 = vperm.xlu1 %1444, %v58_v1   ;;  %v1333_v4 = vld [vmem:[%s2123_s2 + $0x4] sm:$0xf]  ;;  %v310_v7 = vld [vmem:[%s2125_s6 + $0x8] sm:$0xff]  ;;  %199 = vmatprep.mubr.f32.mxu0 %v2135_v9  ;;  %v1550_v14 = vshrl.u32 %v51_v12, 7 }
   0x3   :  { %46 = vperm.xlu0 %1443, %v43_v2   ;;  %v289_v6 = vld [vmem:[%s2124_s5] sm:$0xff]  ;;  %276 = vmatprep.mubr.f32.mxu1 %v2135_v9  ;;  %v50_v13 = vunpack.c.0.s8 %v49_v11  ;;  %v42_v19 = vld [vmem:[%s2126_s0 + $0x8] sm:$0xff]  ;;  %vm128_vm1 = vcmask 64512   ;;  %s1453_s25 = smov 1   ;;  %s1454_s26 = smov 127   ;;  %vm934_vm2 = vcmask 130048  }
   0x4   :  { %v309_v8 = vld [vmem:[%s2125_s6] sm:$0xff]  ;;  %v127_v47 = vld [vmem:[%s2127_s4 + $0x8] sm:$0xff]  ;;  %s1455_s27 = smov 113   ;;  %s1456_s28 = smov 112  }
   0x5   :  { %v53_v15 = vsub.s32 %v50_v13, %v1550_v14  ;;  %v41_v18 = vld [vmem:[%s2126_s0] sm:$0xff]  ;;  %s1457_s29 = smov 111  }
   0x6   :  { %95 = vperm.xlu1 %1444, %v1334_v3   ;;  %v126_v44 = vld [vmem:[%s2127_s4] sm:$0xff]  ;;  %s1450_s4 = smov 17  }
   0x7   :  { %79 = vperm.xlu0 %1443, %v1333_v4  }
   0xa   :  { %298 = vperm.xlu1 %1444, %v290_v5  }
   0xb   :  { %293 = vperm.xlu0 %1443, %v289_v6  }
   0xe   :  { %318 = vperm.xlu1 %1444, %v310_v7  }
   0xf   :  { %313 = vperm.xlu0 %1443, %v309_v8  }
  0x81   :  { %v62_v16 = vpop.permute.xlu1 %61 }
  0x82   :  { %v47_v17 = vpop.permute.xlu0 %46  ;;  %v69_v20 = vrot.slane %v62_v16, %v53_v15 }
  0x83   :  { %v54_v21 = vrot.slane %v47_v17, %v53_v15 }
  0x85   :  { %v56_v22 = vmul.f32 %v54_v21, %v41_v18  ;;  %v57_v23 = vmul.f32 %v54_v21, %v42_v19  ;;  %v96_v24 = vpop.permute.xlu1 %95 }
  0x86   :  { %v80_v25 = vpop.permute.xlu0 %79  ;;  %v103_v29 = vrot.slane %v96_v24, %v53_v15 }
  0x87   :  { %v71_v26 = vadd.f32 %v69_v20, %v56_v22  ;;  %v72_v27 = vadd.f32 %v69_v20, %v57_v23  ;;  %v87_v28 = vrot.slane %v80_v25, %v53_v15 }
  0x89   :  { %v73_v30 = vmax.f32 %v71_v26, 0.0  ;;  %v74_v31 = vmax.f32 %v72_v27, 0.0  ;;  %v89_v32 = vmul.f32 %v87_v28, %v41_v18  ;;  %v90_v33 = vmul.f32 %v87_v28, %v42_v19  ;;  %v1569_v49 = vpop.permute.xlu1 %298  ;;  %v859_v28 = vld [vmem:[%s2128_s7 + $0x8] sm:$0xff] }
  0x8a   :  { %v1567_v48 = vpop.permute.xlu0 %293 }
  0x8b   :  { %v105_v34 = vadd.f32 %v103_v29, %v89_v32  ;;  %v106_v35 = vadd.f32 %v103_v29, %v90_v33  ;;  %v111_v37 = vcombine.high %v73_v30, %v73_v30  ;;  %v112_v39 = vcombine.high %v74_v31, %v74_v31 }
  0x8d   :  { %v107_v36 = vmax.f32 %v105_v34, 0.0  ;;  %v108_v38 = vmax.f32 %v106_v35, 0.0  ;;  %v319_v2 = vpop.permute.xlu1 %318  ;;  %v1115_v34 = vld [vmem:[%s2130_s9] sm:$0xff]  ;;  %v1096_v35 = vld [vmem:[%s2129_s8 + $0x8] sm:$0xff] }
  0x8e   :  { %v314_v56 = vpop.permute.xlu0 %313 }
  0x8f   :  { %v123_v40 = vsel %vm121_vm0, %v111_v37, %v107_v36  ;;  %v125_v41 = vsel %vm121_vm0, %v112_v39, %v108_v38  ;;  %v117_v42 = vcombine.low %v107_v36, %v107_v36  ;;  %v118_v43 = vcombine.low %v108_v38, %v108_v38  ;;  %v1144_v38 = vld [vmem:[%s2131_s11] sm:$0xff]  ;;  %v1116_v39 = vld [vmem:[%s2130_s9 + $0x8] sm:$0xff] }
  0x90   :  { %135 = vmatprep.subr.mxu0 %v123_v40  ;;  %212 = vmatprep.subr.mxu1 %v125_v41 }
  0x91   :  { %v122_v45 = vsel %vm121_vm0, %v73_v30, %v117_v42  ;;  %v124_v46 = vsel %vm121_vm0, %v74_v31, %v118_v43  ;;  %v1095_v31 = vld [vmem:[%s2129_s8] sm:$0xff] }
  0x92   :  { %136 = vmatpush1.msra.mxu0 %v122_v45  ;;  %213 = vmatpush1.msra.mxu1 %v124_v46 }
  0x93   :  { %1335 = vmatmul.mubr.msk.f32.vlgmr.msra.gmra.mrb[0].mxu0 %vm128_vm1, %v126_v44  ;;  %1337 = vmatmul.mubr.msk.f32.vlgmr.msra.gmra.mrb[0].mxu1 %vm128_vm1, %v126_v44 }
  0x94   :  { %205 = vmatprep.mubr.f32.mxu0 %v2135_v9  ;;  %282 = vmatprep.mubr.f32.mxu1 %v2135_v9 }
  0x97   :  { %1336 = vmatmul.mubr.msk.f32.gmra.mrb[2].mxu0 %vm128_vm1, %v127_v47  ;;  %1338 = vmatmul.mubr.msk.f32.gmra.mrb[2].mxu1 %vm128_vm1, %v127_v47 }
  0x98   :  { %1346 = vmatprep.mubr.msk.f32.mxu0 %vm934_vm2, %v859_v28  ;;  %1348 = vmatprep.mubr.msk.f32.mxu1 %vm934_vm2, %v859_v28 }
 0x166   :  { %v201_v50 = vpop.f32.mrb[0].mxu0  ;;  %v278_v51 = vpop.f32.mrb[0].mxu1 }
 0x167   :  { %v301_v52 = vmul.f32 %v1567_v48, %v201_v50  ;;  %v303_v53 = vmul.f32 %v1567_v48, %v278_v51  ;;  %v203_v54 = vpop.f32.mrb[1].mxu0  ;;  %v280_v55 = vpop.f32.mrb[1].mxu1 }
 0x168   :  { %v302_v11 = vmul.f32 %v1567_v48, %v203_v54  ;;  %v304_v15 = vmul.f32 %v1567_v48, %v280_v55 }
 0x169   :  { %v321_v57 = vadd.f32 %v314_v56, %v301_v52  ;;  %v323_v61 = vadd.f32 %v314_v56, %v303_v53 }
 0x16a   :  { %v207_v58 = vpop.f32.mrb[2].mxu0  ;;  %v284_v59 = vpop.f32.mrb[2].mxu1  ;;  %v322_v13 = vadd.f32 %v314_v56, %v302_v11  ;;  %v324_v18 = vadd.f32 %v314_v56, %v304_v15 }
 0x16b   :  { %v1573_v60 = vmax.f32 %v321_v57, 0.0  ;;  %v305_v62 = vmul.f32 %v1569_v49, %v207_v58  ;;  %v307_v63 = vmul.f32 %v1569_v49, %v284_v59  ;;  %v209_v0 = vpop.f32.mrb[3].mxu0  ;;  %v286_v1 = vpop.f32.mrb[3].mxu1  ;;  %v1579_v5 = vmax.f32 %v323_v61, 0.0 }
 0x16c   :  { %v306_v16 = vmul.f32 %v1569_v49, %v209_v0  ;;  %v1652_v17 = vmax.f32 %v322_v13, 0.0  ;;  %v308_v20 = vmul.f32 %v1569_v49, %v286_v1  ;;  %v1659_v21 = vmax.f32 %v324_v18, 0.0  ;;  %v364_v0 = vld [vmem:[%s2132_s1] ss:$8 sm:$0xf] }
 0x16d   :  { %v325_v3 = vadd.f32 %v319_v2, %v305_v62  ;;  %v327_v4 = vadd.f32 %v319_v2, %v307_v63  ;;  %337 = vrot.lane.b32.xlu0 %v1573_v60, %s1450_s4  ;;  %v1806_v61 = vand.u32 127, %v51_v12  ;;  %v1809_v62 = vsub.s32 1, %v1550_v14 }
 0x16e   :  { %v326_v19 = vadd.f32 %v319_v2, %v306_v16  ;;  %v328_v23 = vadd.f32 %v319_v2, %v308_v20  ;;  %v1812_v63 = vsub.s32 2, %v1550_v14  ;;  %v1825_v12 = vsub.s32 3, %v1550_v14 }
 0x16f   :  { %v1581_v6 = vmax.f32 %v325_v3, 0.0  ;;  %v1583_v7 = vmax.f32 %v327_v4, 0.0  ;;  %v1822_v3 = vsub.s32 0, %v1550_v14  ;;  %vm355_vm3 = vcmp.lt.s32.totalorder %v1806_v61, 17 }
 0x170   :  { %v1661_v22 = vmax.f32 %v326_v19, 0.0  ;;  %v1667_v24 = vmax.f32 %v328_v23, 0.0  ;;  %v373_v4 = vrot.slane %v364_v0, %v1809_v62  ;;  %v377_v11 = vrot.slane %v364_v0, %v1812_v63  ;;  %v1339_v14 = vld [vmem:[%s2132_s1 + $0x1] ss:$8 sm:$0xf] }
 0x171   :  { %345 = vrot.lane.b32.xlu0 %v1579_v5, %s1450_s4  ;;  %339 = vrot.lane.b32.xlu1 %v1581_v6, %s1450_s4  ;;  %v369_v23 = vrot.slane %v364_v0, %v1822_v3  ;;  %v381_v28 = vrot.slane %v364_v0, %v1825_v12  ;;  %vm418_vm4 = vcmp.lt.s32.totalorder %v1806_v61, 16  ;;  %vm482_vm5 = vcmp.lt.s32.totalorder %v1806_v61, 15 }
 0x172   :  { %vm546_vm6 = vcmp.lt.s32.totalorder %v1806_v61, 1  ;;  %vm618_vm7 = vcmp.lt.s32.totalorder %v1806_v61, 127  ;;  %vm682_vm8 = vcmp.lt.s32.totalorder %v1806_v61, 113  ;;  %vm746_vm9 = vcmp.lt.s32.totalorder %v1806_v61, 112 }
 0x173   :  { %vm810_vm10 = vcmp.lt.s32.totalorder %v1806_v61, 111  ;;  %v860_v61 = vld [vmem:[%s2128_s7 + $0x10] sm:$0xff] }
 0x175   :  { %402 = vrot.lane.b32.xlu0 %v1573_v60, %s1451_s23  ;;  %347 = vrot.lane.b32.xlu1 %v1583_v7, %s1450_s4 }
 0x179   :  { %410 = vrot.lane.b32.xlu0 %v1579_v5, %s1451_s23  ;;  %404 = vrot.lane.b32.xlu1 %v1581_v6, %s1451_s23 }
 0x17d   :  { %466 = vrot.lane.b32.xlu0 %v1573_v60, %s1452_s24  ;;  %412 = vrot.lane.b32.xlu1 %v1583_v7, %s1451_s23 }
 0x181   :  { %474 = vrot.lane.b32.xlu0 %v1579_v5, %s1452_s24  ;;  %468 = vrot.lane.b32.xlu1 %v1581_v6, %s1452_s24 }
 0x185   :  { %530 = vrot.lane.b32.xlu0 %v1573_v60, %s1453_s25  ;;  %476 = vrot.lane.b32.xlu1 %v1583_v7, %s1452_s24 }
 0x189   :  { %538 = vrot.lane.b32.xlu0 %v1579_v5, %s1453_s25  ;;  %532 = vrot.lane.b32.xlu1 %v1581_v6, %s1453_s25 }
 0x18d   :  { %602 = vrot.lane.b32.xlu0 %v1573_v60, %s1454_s26  ;;  %540 = vrot.lane.b32.xlu1 %v1583_v7, %s1453_s25 }
 0x191   :  { %610 = vrot.lane.b32.xlu0 %v1579_v5, %s1454_s26  ;;  %604 = vrot.lane.b32.xlu1 %v1581_v6, %s1454_s26 }
 0x195   :  { %666 = vrot.lane.b32.xlu0 %v1573_v60, %s1455_s27  ;;  %612 = vrot.lane.b32.xlu1 %v1583_v7, %s1454_s26 }
 0x199   :  { %674 = vrot.lane.b32.xlu0 %v1579_v5, %s1455_s27  ;;  %668 = vrot.lane.b32.xlu1 %v1581_v6, %s1455_s27 }
 0x19d   :  { %730 = vrot.lane.b32.xlu0 %v1573_v60, %s1456_s28  ;;  %676 = vrot.lane.b32.xlu1 %v1583_v7, %s1455_s27 }
 0x1a1   :  { %738 = vrot.lane.b32.xlu0 %v1579_v5, %s1456_s28  ;;  %732 = vrot.lane.b32.xlu1 %v1581_v6, %s1456_s28 }
 0x1a5   :  { %794 = vrot.lane.b32.xlu0 %v1573_v60, %s1457_s29  ;;  %740 = vrot.lane.b32.xlu1 %v1583_v7, %s1456_s28 }
 0x1a9   :  { %802 = vrot.lane.b32.xlu0 %v1579_v5, %s1457_s29  ;;  %796 = vrot.lane.b32.xlu1 %v1581_v6, %s1457_s29 }
 0x1ad   :  { %341 = vrot.lane.b32.xlu0 %v1652_v17, %s1450_s4  ;;  %804 = vrot.lane.b32.xlu1 %v1583_v7, %s1457_s29 }
 0x1b1   :  { %349 = vrot.lane.b32.xlu0 %v1659_v21, %s1450_s4  ;;  %343 = vrot.lane.b32.xlu1 %v1661_v22, %s1450_s4 }
 0x1b5   :  { %406 = vrot.lane.b32.xlu0 %v1652_v17, %s1451_s23  ;;  %351 = vrot.lane.b32.xlu1 %v1667_v24, %s1450_s4 }
 0x1b9   :  { %414 = vrot.lane.b32.xlu0 %v1659_v21, %s1451_s23  ;;  %408 = vrot.lane.b32.xlu1 %v1661_v22, %s1451_s23 }
 0x1bd   :  { %470 = vrot.lane.b32.xlu0 %v1652_v17, %s1452_s24  ;;  %416 = vrot.lane.b32.xlu1 %v1667_v24, %s1451_s23 }
 0x1c1   :  { %478 = vrot.lane.b32.xlu0 %v1659_v21, %s1452_s24  ;;  %472 = vrot.lane.b32.xlu1 %v1661_v22, %s1452_s24 }
 0x1c5   :  { %534 = vrot.lane.b32.xlu0 %v1652_v17, %s1453_s25  ;;  %480 = vrot.lane.b32.xlu1 %v1667_v24, %s1452_s24 }
 0x1c9   :  { %542 = vrot.lane.b32.xlu0 %v1659_v21, %s1453_s25  ;;  %536 = vrot.lane.b32.xlu1 %v1661_v22, %s1453_s25 }
 0x1cd   :  { %606 = vrot.lane.b32.xlu0 %v1652_v17, %s1454_s26  ;;  %544 = vrot.lane.b32.xlu1 %v1667_v24, %s1453_s25 }
 0x1d1   :  { %614 = vrot.lane.b32.xlu0 %v1659_v21, %s1454_s26  ;;  %608 = vrot.lane.b32.xlu1 %v1661_v22, %s1454_s26 }
 0x1d5   :  { %670 = vrot.lane.b32.xlu0 %v1652_v17, %s1455_s27  ;;  %616 = vrot.lane.b32.xlu1 %v1667_v24, %s1454_s26 }
 0x1d9   :  { %678 = vrot.lane.b32.xlu0 %v1659_v21, %s1455_s27  ;;  %672 = vrot.lane.b32.xlu1 %v1661_v22, %s1455_s27 }
 0x1dd   :  { %734 = vrot.lane.b32.xlu0 %v1652_v17, %s1456_s28  ;;  %680 = vrot.lane.b32.xlu1 %v1667_v24, %s1455_s27 }
 0x1df   :  { %v1713_v25 = vpop.permute.xlu0 %337 }
 0x1e1   :  { %742 = vrot.lane.b32.xlu0 %v1659_v21, %s1456_s28  ;;  %736 = vrot.lane.b32.xlu1 %v1661_v22, %s1456_s28 }
 0x1e3   :  { %v1719_v26 = vpop.permute.xlu0 %345  ;;  %v1721_v27 = vpop.permute.xlu1 %339 }
 0x1e5   :  { %798 = vrot.lane.b32.xlu0 %v1652_v17, %s1457_s29  ;;  %744 = vrot.lane.b32.xlu1 %v1667_v24, %s1456_s28 }
 0x1e7   :  { %v1732_v29 = vpop.permute.xlu0 %402  ;;  %v1734_v30 = vpop.permute.xlu1 %347 }
 0x1e9   :  { %806 = vrot.lane.b32.xlu0 %v1659_v21, %s1457_s29  ;;  %800 = vrot.lane.b32.xlu1 %v1661_v22, %s1457_s29 }
 0x1eb   :  { %v1743_v32 = vpop.permute.xlu0 %410  ;;  %v1745_v33 = vpop.permute.xlu1 %404 }
 0x1ed   :  { %1099 = vperm.xlu0 %1443, %v1095_v31   ;;  %808 = vrot.lane.b32.xlu1 %v1667_v24, %s1457_s29 }
 0x1ef   :  { %v1755_v36 = vpop.permute.xlu0 %466  ;;  %v1757_v37 = vpop.permute.xlu1 %412 }
 0x1f1   :  { %1119 = vperm.xlu0 %1443, %v1115_v34   ;;  %1104 = vperm.xlu1 %1444, %v1096_v35   ;;  %v437_v35 = vrot.slane %v1339_v14, %v1809_v62 }
 0x1f3   :  { %v1765_v40 = vpop.permute.xlu0 %474  ;;  %v1767_v41 = vpop.permute.xlu1 %468 }
 0x1f5   :  { %1147 = vperm.xlu0 %1443, %v1144_v38   ;;  %1124 = vperm.xlu1 %1444, %v1116_v39   ;;  %v441_v38 = vrot.slane %v1339_v14, %v1812_v63 }
 0x1f7   :  { %v1769_v42 = vpop.permute.xlu0 %530  ;;  %v1771_v43 = vpop.permute.xlu1 %476 }
 0x1fb   :  { %v1773_v44 = vpop.permute.xlu0 %538  ;;  %v1775_v45 = vpop.permute.xlu1 %532 }
 0x1ff   :  { %v1777_v46 = vpop.permute.xlu0 %602  ;;  %v1779_v47 = vpop.permute.xlu1 %540 }
 0x203   :  { %v1781_v48 = vpop.permute.xlu0 %610  ;;  %v1783_v49 = vpop.permute.xlu1 %604 }
 0x207   :  { %v1785_v50 = vpop.permute.xlu0 %666  ;;  %v1787_v51 = vpop.permute.xlu1 %612 }
 0x20b   :  { %v1789_v52 = vpop.permute.xlu0 %674  ;;  %v1791_v53 = vpop.permute.xlu1 %668 }
 0x20f   :  { %v1793_v54 = vpop.permute.xlu0 %730  ;;  %v1795_v55 = vpop.permute.xlu1 %676 }
 0x213   :  { %v1797_v56 = vpop.permute.xlu0 %738  ;;  %v1799_v57 = vpop.permute.xlu1 %732 }
 0x217   :  { %v1801_v58 = vpop.permute.xlu0 %794  ;;  %v1803_v59 = vpop.permute.xlu1 %740 }
 0x218   :  { %2141 = vst [vmem:[#allocation3_spill] sm:$0xff] %v1801_v58 }
 0x21b   :  { %v1817_v1 = vpop.permute.xlu0 %802  ;;  %v1819_v2 = vpop.permute.xlu1 %796 }
 0x21c   :  { %2142 = vst [vmem:[#allocation4_spill] sm:$0xff] %v1817_v1  ;;  %2143 = vst [vmem:[#allocation5_spill] sm:$0xff] %v1819_v2  ;;  %v433_v1 = vrot.slane %v1339_v14, %v1822_v3 }
 0x21f   :  { %v342_v13 = vpop.permute.xlu0 %341  ;;  %v1830_v15 = vpop.permute.xlu1 %804 }
 0x220   :  { %2144 = vst [vmem:[#allocation6_spill] sm:$0xff] %v1830_v15  ;;  %v358_v16 = vsel %vm355_vm3, %v342_v13, %v1719_v26  ;;  %v360_v18 = vsel %vm355_vm3, %v1713_v25, %v342_v13 }
 0x221   :  { %v387_v19 = vmul.f32 %v373_v4, %v360_v18  ;;  %v388_v20 = vmul.f32 %v377_v11, %v358_v16 }
 0x223   :  { %v350_v31 = vpop.permute.xlu0 %349  ;;  %v344_v34 = vpop.permute.xlu1 %343 }
 0x224   :  { %v356_v39 = vsel %vm355_vm3, %v1719_v26, %v350_v31  ;;  %v362_v13 = vsel %vm355_vm3, %v350_v31, %v1713_v25  ;;  %v359_v0 = vsel %vm355_vm3, %v344_v34, %v1734_v30  ;;  %v361_v16 = vsel %vm355_vm3, %v1721_v27, %v344_v34 }
 0x225   :  { %v386_v18 = vmul.f32 %v369_v23, %v362_v13  ;;  %v389_v9 = vmul.f32 %v381_v28, %v356_v39  ;;  %v391_v10 = vmul.f32 %v373_v4, %v361_v16  ;;  %v392_v8 = vmul.f32 %v377_v11, %v359_v0 }
 0x226   :  { %v445_v25 = vrot.slane %v1339_v14, %v1825_v12 }
 0x227   :  { %v1390_v2 = vpack.c.bf16 %v392_v8, %v388_v20  ;;  %v407_v15 = vpop.permute.xlu0 %406  ;;  %v352_v58 = vpop.permute.xlu1 %351  ;;  %v1352_v26 = vpack.c.bf16 %v391_v10, %v387_v19  ;;  %v1340_v10 = vld [vmem:[%s2132_s1 + $0x2] ss:$8 sm:$0xf] }
 0x228   :  { %v421_v31 = vsel %vm418_vm4, %v407_v15, %v1743_v32  ;;  %v423_v34 = vsel %vm418_vm4, %v1732_v29, %v407_v15  ;;  %v357_v4 = vsel %vm355_vm3, %v1734_v30, %v352_v58  ;;  %v363_v8 = vsel %vm355_vm3, %v352_v58, %v1721_v27 }
 0x229   :  { %v451_v11 = vmul.f32 %v437_v35, %v423_v34  ;;  %v452_v14 = vmul.f32 %v441_v38, %v421_v31  ;;  %v390_v19 = vmul.f32 %v369_v23, %v363_v8  ;;  %v393_v20 = vmul.f32 %v381_v28, %v357_v4  ;;  %1353 = vmatprep.subr.bf16.mxu0 %v1352_v26 }
 0x22a   :  { %v501_v30 = vrot.slane %v1340_v10, %v1809_v62  ;;  %v505_v16 = vrot.slane %v1340_v10, %v1812_v63 }
 0x22b   :  { %v1354_v15 = vpack.c.bf16 %v390_v19, %v386_v18  ;;  %v415_v39 = vpop.permute.xlu0 %414  ;;  %v409_v13 = vpop.permute.xlu1 %408  ;;  %v1388_v0 = vpack.c.bf16 %v393_v20, %v389_v9  ;;  %v509_v19 = vrot.slane %v1340_v10, %v1825_v12 }
 0x22c   :  { %v419_v27 = vsel %vm418_vm4, %v1743_v32, %v415_v39  ;;  %v425_v58 = vsel %vm418_vm4, %v415_v39, %v1732_v29  ;;  %v422_v23 = vsel %vm418_vm4, %v409_v13, %v1757_v37  ;;  %v424_v9 = vsel %vm418_vm4, %v1745_v33, %v409_v13 }
 0x22d   :  { %v450_v28 = vmul.f32 %v433_v1, %v425_v58  ;;  %v453_v18 = vmul.f32 %v445_v25, %v419_v27  ;;  %v455_v26 = vmul.f32 %v437_v35, %v424_v9  ;;  %v456_v31 = vmul.f32 %v441_v38, %v422_v23  ;;  %1355 = vmatpush1.bf16.msra.mxu0 %v1354_v15 }
 0x22e   :  { %1389 = vmatprep.subr.bf16.mxu1 %v1388_v0  ;;  %v497_v29 = vrot.slane %v1340_v10, %v1822_v3  ;;  %v1341_v10 = vld [vmem:[%s2132_s1 + $0x3] ss:$8 sm:$0xf] }
 0x22f   :  { %v1394_v34 = vpack.c.bf16 %v456_v31, %v452_v14  ;;  %1391 = vmatpush1.bf16.msra.mxu1 %v1390_v2  ;;  %v471_v32 = vpop.permute.xlu0 %470  ;;  %v417_v4 = vpop.permute.xlu1 %416  ;;  %v1356_v8 = vpack.c.bf16 %v455_v26, %v451_v11  ;;  %v569_v23 = vrot.slane %v1341_v10, %v1812_v63 }
 0x230   :  { %v485_v20 = vsel %vm482_vm5, %v471_v32, %v1765_v40  ;;  %v487_v35 = vsel %vm482_vm5, %v1755_v36, %v471_v32  ;;  %v420_v38 = vsel %vm418_vm4, %v1757_v37, %v417_v4  ;;  %v426_v2 = vsel %vm418_vm4, %v417_v4, %v1745_v33 }
 0x231   :  { %v515_v11 = vmul.f32 %v501_v30, %v487_v35  ;;  %v516_v14 = vmul.f32 %v505_v16, %v485_v20  ;;  %v454_v15 = vmul.f32 %v433_v1, %v426_v2  ;;  %v457_v39 = vmul.f32 %v445_v25, %v420_v38  ;;  %1357 = vmatprep.subr.bf16.mxu0 %v1356_v8  ;;  %v1342_v38 = vld [vmem:[%s2132_s1 + $0x5] ss:$8 sm:$0xf] }
 0x232   :  { %v565_v37 = vrot.slane %v1341_v10, %v1809_v62  ;;  %v573_v20 = vrot.slane %v1341_v10, %v1825_v12 }
 0x233   :  { %v1358_v13 = vpack.c.bf16 %v454_v15, %v450_v28  ;;  %v479_v0 = vpop.permute.xlu0 %478  ;;  %v473_v27 = vpop.permute.xlu1 %472  ;;  %v1392_v58 = vpack.c.bf16 %v457_v39, %v453_v18 }
 0x234   :  { %v483_v33 = vsel %vm482_vm5, %v1765_v40, %v479_v0  ;;  %v489_v1 = vsel %vm482_vm5, %v479_v0, %v1755_v36  ;;  %v486_v25 = vsel %vm482_vm5, %v473_v27, %v1771_v43  ;;  %v488_v9 = vsel %vm482_vm5, %v1767_v41, %v473_v27 }
 0x235   :  { %v514_v28 = vmul.f32 %v497_v29, %v489_v1  ;;  %v517_v18 = vmul.f32 %v509_v19, %v483_v33  ;;  %v519_v26 = vmul.f32 %v501_v30, %v488_v9  ;;  %v520_v31 = vmul.f32 %v505_v16, %v486_v25  ;;  %1359 = vmatpush1.bf16.msra.mxu0 %v1358_v13 }
 0x236   :  { %1393 = vmatprep.subr.bf16.mxu1 %v1392_v58  ;;  %v561_v36 = vrot.slane %v1341_v10, %v1822_v3  ;;  %v637_v27 = vrot.slane %v1342_v38, %v1809_v62 }
 0x237   :  { %v1398_v32 = vpack.c.bf16 %v520_v31, %v516_v14  ;;  %1395 = vmatpush1.bf16.msra.mxu1 %v1394_v34  ;;  %v535_v40 = vpop.permute.xlu0 %534  ;;  %v481_v4 = vpop.permute.xlu1 %480  ;;  %v1360_v8 = vpack.c.bf16 %v519_v26, %v515_v11  ;;  %v645_v31 = vrot.slane %v1342_v38, %v1825_v12 }
 0x238   :  { %v549_v35 = vsel %vm546_vm6, %v535_v40, %v1773_v44  ;;  %v551_v30 = vsel %vm546_vm6, %v1769_v42, %v535_v40  ;;  %v484_v16 = vsel %vm482_vm5, %v1771_v43, %v481_v4  ;;  %v490_v34 = vsel %vm482_vm5, %v481_v4, %v1767_v41  ;;  %v1343_v4 = vld [vmem:[%s2132_s1 + $0x6] ss:$8 sm:$0xf] }
 0x239   :  { %v579_v2 = vmul.f32 %v565_v37, %v551_v30  ;;  %v580_v10 = vmul.f32 %v569_v23, %v549_v35  ;;  %v518_v11 = vmul.f32 %v497_v29, %v490_v34  ;;  %v521_v14 = vmul.f32 %v509_v19, %v484_v16  ;;  %1361 = vmatprep.subr.bf16.mxu0 %v1360_v8 }
 0x23a   :  { %v633_v43 = vrot.slane %v1342_v38, %v1822_v3  ;;  %v1368_v34 = vpack.c.bf16 %v1661_v22, %v1652_v17 }
 0x23b   :  { %v1362_v15 = vpack.c.bf16 %v518_v11, %v514_v28  ;;  %v543_v39 = vpop.permute.xlu0 %542  ;;  %v537_v13 = vpop.permute.xlu1 %536  ;;  %v1396_v0 = vpack.c.bf16 %v521_v14, %v517_v18  ;;  %v701_v11 = vrot.slane %v1343_v4, %v1809_v62 }
 0x23c   :  { %v547_v41 = vsel %vm546_vm6, %v1773_v44, %v543_v39  ;;  %v553_v29 = vsel %vm546_vm6, %v543_v39, %v1769_v42  ;;  %v550_v19 = vsel %vm546_vm6, %v537_v13, %v1779_v47  ;;  %v552_v58 = vsel %vm546_vm6, %v1775_v45, %v537_v13 }
 0x23d   :  { %v578_v33 = vmul.f32 %v561_v36, %v553_v29  ;;  %v581_v1 = vmul.f32 %v573_v20, %v547_v41  ;;  %v583_v25 = vmul.f32 %v565_v37, %v552_v58  ;;  %v584_v9 = vmul.f32 %v569_v23, %v550_v19  ;;  %1363 = vmatpush1.bf16.msra.mxu0 %v1362_v15 }
 0x23e   :  { %1397 = vmatprep.subr.bf16.mxu1 %v1396_v0  ;;  %v641_v42 = vrot.slane %v1342_v38, %v1812_v63  ;;  %v705_v19 = vrot.slane %v1343_v4, %v1812_v63  ;;  %v709_v58 = vrot.slane %v1343_v4, %v1825_v12 }
 0x23f   :  { %v1402_v28 = vpack.c.bf16 %v584_v9, %v580_v10  ;;  %1399 = vmatpush1.bf16.msra.mxu1 %v1398_v32  ;;  %v607_v44 = vpop.permute.xlu0 %606  ;;  %v545_v18 = vpop.permute.xlu1 %544  ;;  %v1364_v26 = vpack.c.bf16 %v583_v25, %v579_v2 }
 0x240   :  { %v621_v40 = vsel %vm618_vm7, %v607_v44, %v1781_v48  ;;  %v623_v37 = vsel %vm618_vm7, %v1777_v46, %v607_v44  ;;  %v548_v23 = vsel %vm546_vm6, %v1779_v47, %v545_v18  ;;  %v554_v32 = vsel %vm546_vm6, %v545_v18, %v1775_v45 }
 0x241   :  { %v650_v8 = vmul.f32 %v633_v43, %v623_v37  ;;  %v651_v35 = vmul.f32 %v637_v27, %v621_v40  ;;  %v582_v30 = vmul.f32 %v561_v36, %v554_v32  ;;  %v585_v16 = vmul.f32 %v573_v20, %v548_v23  ;;  %1365 = vmatprep.subr.bf16.mxu0 %v1364_v26 }
 0x242   :  { %v697_v45 = vrot.slane %v1343_v4, %v1822_v3  ;;  %v2145_v44 = vpack.c.bf16 %v1581_v6, %v1573_v60  ;;  %v2146_v18 = vpack.c.bf16 %v1583_v7, %v1579_v5 }
 0x243   :  { %v1366_v38 = vpack.c.bf16 %v582_v30, %v578_v33  ;;  %v615_v47 = vpop.permute.xlu0 %614  ;;  %v609_v2 = vpop.permute.xlu1 %608  ;;  %v1400_v10 = vpack.c.bf16 %v585_v16, %v581_v1  ;;  %v1344_v33 = vld [vmem:[%s2132_s1 + $0x7] ss:$8 sm:$0xf] }
 0x244   :  { %v619_v14 = vsel %vm618_vm7, %v1781_v48, %v615_v47  ;;  %v625_v36 = vsel %vm618_vm7, %v615_v47, %v1777_v46  ;;  %v622_v17 = vsel %vm618_vm7, %v609_v2, %v1787_v51  ;;  %v624_v22 = vsel %vm618_vm7, %v1783_v49, %v609_v2 }
 0x245   :  { %v652_v20 = vmul.f32 %v641_v42, %v619_v14  ;;  %v653_v15 = vmul.f32 %v645_v31, %v625_v36  ;;  %v654_v39 = vmul.f32 %v633_v43, %v624_v22  ;;  %v655_v13 = vmul.f32 %v637_v27, %v622_v17  ;;  %1367 = vmatpush1.bf16.msra.mxu0 %v1366_v38 }
 0x246   :  { %1401 = vmatprep.subr.bf16.mxu1 %v1400_v10  ;;  %1369 = vmatprep.subr.bf16.mxu0 %v1368_v34  ;;  %v1404_v48 = vpack.c.bf16 %v1667_v24, %v1659_v21  ;;  %v761_v37 = vrot.slane %v1344_v33, %v1822_v3  ;;  %v773_v16 = vrot.slane %v1344_v33, %v1825_v12  ;;  %v1345_v10 = vld [vmem:[%s2132_s1 + $0x20] ss:$8 sm:$0xf] }
 0x247   :  { %v1374_v0 = vpack.c.bf16 %v654_v39, %v650_v8  ;;  %1403 = vmatpush1.bf16.msra.mxu1 %v1402_v28  ;;  %v671_v46 = vpop.permute.xlu0 %670  ;;  %v617_v41 = vpop.permute.xlu1 %616  ;;  %v1372_v29 = vpack.c.bf16 %v655_v13, %v651_v35 }
 0x248   :  { %v685_v43 = vsel %vm682_vm8, %v671_v46, %v1789_v52  ;;  %v687_v27 = vsel %vm682_vm8, %v1785_v50, %v671_v46  ;;  %1405 = vmatprep.subr.bf16.mxu1 %v1404_v48  ;;  %v620_v21 = vsel %vm618_vm7, %v1787_v51, %v617_v41  ;;  %v626_v24 = vsel %vm618_vm7, %v617_v41, %v1783_v49 }
 0x249   :  { %v714_v1 = vmul.f32 %v697_v45, %v687_v27  ;;  %v715_v25 = vmul.f32 %v701_v11, %v685_v43  ;;  %v656_v9 = vmul.f32 %v641_v42, %v620_v21  ;;  %v657_v28 = vmul.f32 %v645_v31, %v626_v24  ;;  %1371 = vmatpush1.bf16.msra.mxu0 %v2145_v44  ;;  %v2147_v27 = vld [vmem:[#allocation4_spill] sm:$0xff]  ;;  %v2148_v24 = vld [vmem:[#allocation3_spill] sm:$0xff] }
 0x24a   :  { %1373 = vmatprep.subr.bf16.mxu0 %v1372_v29  ;;  %v765_v42 = vrot.slane %v1344_v33, %v1809_v62  ;;  %v837_v43 = vrot.slane %v1345_v10, %v1825_v12 }
 0x24b   :  { %v1410_v51 = vpack.c.bf16 %v656_v9, %v652_v20  ;;  %1407 = vmatpush1.bf16.msra.mxu1 %v2146_v18  ;;  %v679_v49 = vpop.permute.xlu0 %678  ;;  %v673_v26 = vpop.permute.xlu1 %672  ;;  %v1408_v40 = vpack.c.bf16 %v657_v28, %v653_v15  ;;  %v825_v15 = vrot.slane %v1345_v10, %v1822_v3 }
 0x24c   :  { %v683_v60 = vsel %vm682_vm8, %v1789_v52, %v679_v49  ;;  %v689_v6 = vsel %vm682_vm8, %v679_v49, %v1785_v50  ;;  %v686_v5 = vsel %vm682_vm8, %v673_v26, %v1795_v55  ;;  %v688_v7 = vsel %vm682_vm8, %v1791_v53, %v673_v26 }
 0x24d   :  { %v716_v31 = vmul.f32 %v705_v19, %v683_v60  ;;  %v717_v23 = vmul.f32 %v709_v58, %v689_v6  ;;  %v718_v32 = vmul.f32 %v697_v45, %v688_v7  ;;  %v719_v4 = vmul.f32 %v701_v11, %v686_v5  ;;  %1375 = vmatpush1.bf16.msra.mxu0 %v1374_v0 }
 0x24e   :  { %1409 = vmatprep.subr.bf16.mxu1 %v1408_v40  ;;  %v769_v50 = vrot.slane %v1344_v33, %v1812_v63  ;;  %v2149_v40 = vld [vmem:[#allocation6_spill] sm:$0xff] }
 0x24f   :  { %v1378_v8 = vpack.c.bf16 %v718_v32, %v714_v1  ;;  %1411 = vmatpush1.bf16.msra.mxu1 %v1410_v51  ;;  %v735_v52 = vpop.permute.xlu0 %734  ;;  %v681_v35 = vpop.permute.xlu1 %680  ;;  %v1376_v30 = vpack.c.bf16 %v719_v4, %v715_v25 }
 0x250   :  { %v749_v34 = vsel %vm746_vm9, %v735_v52, %v1797_v56  ;;  %v751_v38 = vsel %vm746_vm9, %v1793_v54, %v735_v52  ;;  %v684_v47 = vsel %vm682_vm8, %v1795_v55, %v681_v35  ;;  %v690_v2 = vsel %vm682_vm8, %v681_v35, %v1791_v53 }
 0x251   :  { %v778_v45 = vmul.f32 %v761_v37, %v751_v38  ;;  %v779_v11 = vmul.f32 %v765_v42, %v749_v34  ;;  %v720_v14 = vmul.f32 %v705_v19, %v684_v47  ;;  %v721_v36 = vmul.f32 %v709_v58, %v690_v2  ;;  %1377 = vmatprep.subr.bf16.mxu0 %v1376_v30  ;;  %v858_v30 = vld [vmem:[%s2128_s7] sm:$0xff]  ;;  %v861_v34 = vld [vmem:[%s2128_s7 + $0x18] sm:$0xff] }
 0x252   :  { %1379 = vmatpush1.bf16.msra.mxu0 %v1378_v8  ;;  %v829_v53 = vrot.slane %v1345_v10, %v1809_v62  ;;  %v2151_v38 = vmov 0.0  }
 0x253   :  { %v1414_v17 = vpack.c.bf16 %v720_v14, %v716_v31  ;;  %v743_v22 = vpop.permute.xlu0 %742  ;;  %v737_v20 = vpop.permute.xlu1 %736  ;;  %v1412_v55 = vpack.c.bf16 %v721_v36, %v717_v23 }
 0x254   :  { %v747_v39 = vsel %vm746_vm9, %v1797_v56, %v743_v22  ;;  %v753_v13 = vsel %vm746_vm9, %v743_v22, %v1793_v54  ;;  %v750_v48 = vsel %vm746_vm9, %v737_v20, %v1803_v59  ;;  %v752_v0 = vsel %vm746_vm9, %v1799_v57, %v737_v20 }
 0x255   :  { %v780_v46 = vmul.f32 %v769_v50, %v747_v39  ;;  %v781_v3 = vmul.f32 %v773_v16, %v753_v13  ;;  %v782_v41 = vmul.f32 %v761_v37, %v752_v0  ;;  %v783_v62 = vmul.f32 %v765_v42, %v750_v48  ;;  %1413 = vmatprep.subr.bf16.mxu1 %v1412_v55  ;;  %v2150_v37 = vld [vmem:[#allocation5_spill] sm:$0xff] }
 0x256   :  { %1415 = vmatpush1.bf16.msra.mxu1 %v1414_v17  ;;  %v833_v54 = vrot.slane %v1345_v10, %v1812_v63 }
 0x257   :  { %v1382_v29 = vpack.c.bf16 %v782_v41, %v778_v45  ;;  %v799_v56 = vpop.permute.xlu0 %798  ;;  %v745_v19 = vpop.permute.xlu1 %744  ;;  %v1380_v58 = vpack.c.bf16 %v783_v62, %v779_v11 }
 0x258   :  { %v813_v21 = vsel %vm810_vm10, %v799_v56, %v2147_v27  ;;  %v815_v33 = vsel %vm810_vm10, %v2148_v24, %v799_v56  ;;  %v748_v1 = vsel %vm746_vm9, %v1803_v59, %v745_v19  ;;  %v754_v25 = vsel %vm746_vm9, %v745_v19, %v1799_v57 }
 0x259   :  { %v842_v9 = vmul.f32 %v825_v15, %v815_v33  ;;  %v843_v63 = vmul.f32 %v829_v53, %v813_v21  ;;  %v784_v28 = vmul.f32 %v769_v50, %v748_v1  ;;  %v785_v12 = vmul.f32 %v773_v16, %v754_v25  ;;  %1381 = vmatprep.subr.bf16.mxu0 %v1380_v58 }
 0x25a   :  { %1383 = vmatpush1.bf16.msra.mxu0 %v1382_v29 }
 0x25b   :  { %v1418_v44 = vpack.c.bf16 %v784_v28, %v780_v46  ;;  %v807_v51 = vpop.permute.xlu0 %806  ;;  %v801_v18 = vpop.permute.xlu1 %800  ;;  %v1416_v49 = vpack.c.bf16 %v785_v12, %v781_v3 }
 0x25c   :  { %v811_v26 = vsel %vm810_vm10, %v2147_v27, %v807_v51  ;;  %v817_v59 = vsel %vm810_vm10, %v807_v51, %v2148_v24  ;;  %v814_v57 = vsel %vm810_vm10, %v801_v18, %v2149_v40  ;;  %v816_v42 = vsel %vm810_vm10, %v2150_v37, %v801_v18  ;;  %v1143_v18 = vld [vmem:[%s2133_s10] sm:$0xff] }
 0x25d   :  { %v844_v60 = vmul.f32 %v833_v54, %v811_v26  ;;  %v845_v6 = vmul.f32 %v837_v43, %v817_v59  ;;  %v846_v5 = vmul.f32 %v825_v15, %v816_v42  ;;  %v847_v7 = vmul.f32 %v829_v53, %v814_v57  ;;  %1417 = vmatprep.subr.bf16.mxu1 %v1416_v49 }
 0x25e   :  { %1419 = vmatpush1.bf16.msra.mxu1 %v1418_v44 }
 0x25f   :  { %v1386_v31 = vpack.c.bf16 %v846_v5, %v842_v9  ;;  %v809_v23 = vpop.permute.xlu1 %808  ;;  %v1384_v32 = vpack.c.bf16 %v847_v7, %v843_v63 }
 0x260   :  { %v812_v4 = vsel %vm810_vm10, %v2149_v40, %v809_v23  ;;  %v818_v8 = vsel %vm810_vm10, %v809_v23, %v2150_v37 }
 0x261   :  { %v848_v52 = vmul.f32 %v833_v54, %v812_v4  ;;  %v849_v35 = vmul.f32 %v837_v43, %v818_v8  ;;  %1385 = vmatprep.subr.bf16.mxu0 %v1384_v32 }
 0x262   :  { %1387 = vmatpush1.bf16.msra.mxu0 %v1386_v31 }
 0x263   :  { %v1422_v50 = vpack.c.bf16 %v848_v52, %v844_v60  ;;  %v1420_v16 = vpack.c.bf16 %v849_v35, %v845_v6  ;;  %v1445_v52 = vld [vmem:[%s2126_s0] sm:$0xff] }
 0x264   :  { %v1295_v35 = vmul.f32 2.0, %v1445_v52 }
 0x265   :  { %1006 = vmatmul.mubr.f32.vlgmr.msra.gmra.mrb[4].mxu0 %v858_v30  ;;  %1421 = vmatprep.subr.bf16.mxu1 %v1420_v16 }
 0x266   :  { %1423 = vmatpush1.bf16.msra.mxu1 %v1422_v50  ;;  %1347 = vmatprep.mubr.msk.f32.mxu0 %vm934_vm2, %v861_v34 }
 0x269   :  { %1012 = vmatmul.mubr.f32.gmra.mrb[6].mxu0 %v860_v61  ;;  %1083 = vmatmul.mubr.f32.vlgmr.msra.gmra.mrb[4].mxu1 %v858_v30 }
 0x26a   :  { %1349 = vmatprep.mubr.msk.f32.mxu1 %vm934_vm2, %v861_v34  ;;  %1217 = vmatprep.mubr.f32.mxu0 %v2151_v38 }
 0x26c   :  { %v1100_v47 = vpop.permute.xlu0 %1099 }
 0x26d   :  { %1089 = vmatmul.mubr.f32.gmra.mrb[6].mxu1 %v860_v61 }
 0x26e   :  { %1288 = vmatprep.mubr.f32.mxu1 %v2151_v38 }
 0x270   :  { %v1105_v2 = vpop.permute.xlu1 %1104  ;;  %v1120_v36 = vpop.permute.xlu0 %1119 }
 0x274   :  { %v1125_v13 = vpop.permute.xlu1 %1124  ;;  %v1148_v26 = vpop.permute.xlu0 %1147 }
 0x338   :  { %v1007_v10 = vpop.f32.mrb[4].mxu0 }
 0x339   :  { %v1107_v45 = vmul.f32 %v1100_v47, %v1007_v10  ;;  %v1009_v11 = vpop.f32.mrb[5].mxu0 }
 0x33a   :  { %v1108_v14 = vmul.f32 %v1100_v47, %v1009_v11 }
 0x33b   :  { %v1127_v20 = vadd.f32 %v1120_v36, %v1107_v45 }
 0x33c   :  { %v1013_v17 = vpop.f32.mrb[6].mxu0  ;;  %v1084_v22 = vpop.f32.mrb[4].mxu1  ;;  %v1128_v48 = vadd.f32 %v1120_v36, %v1108_v14 }
 0x33d   :  { %v1111_v55 = vmul.f32 %v1105_v2, %v1013_v17  ;;  %v1109_v15 = vmul.f32 %v1100_v47, %v1084_v22  ;;  %v1015_v53 = vpop.f32.mrb[7].mxu0  ;;  %v1086_v39 = vpop.f32.mrb[5].mxu1  ;;  %v1135_v29 = vmax.f32 %v1127_v20, 0.0 }
 0x33e   :  { %v1112_v0 = vmul.f32 %v1105_v2, %v1015_v53  ;;  %v1110_v46 = vmul.f32 %v1100_v47, %v1086_v39  ;;  %v1136_v43 = vmax.f32 %v1128_v48, 0.0  ;;  %v1446_v47 = vld [vmem:[%s2126_s0 + $0x8] sm:$0xff] }
 0x33f   :  { %v1131_v3 = vadd.f32 %v1125_v13, %v1111_v55  ;;  %v1129_v19 = vadd.f32 %v1120_v36, %v1109_v15 }
 0x340   :  { %v1132_v41 = vadd.f32 %v1125_v13, %v1112_v0  ;;  %v1090_v62 = vpop.f32.mrb[6].mxu1  ;;  %v1130_v21 = vadd.f32 %v1120_v36, %v1110_v46 }
 0x341   :  { %v1139_v56 = vmax.f32 %v1131_v3, 0.0  ;;  %v1113_v58 = vmul.f32 %v1105_v2, %v1090_v62  ;;  %v1092_v54 = vpop.f32.mrb[7].mxu1  ;;  %v1137_v63 = vmax.f32 %v1129_v19, 0.0 }
 0x342   :  { %v1140_v27 = vmax.f32 %v1132_v41, 0.0  ;;  %v1114_v24 = vmul.f32 %v1105_v2, %v1092_v54  ;;  %v1138_v12 = vmax.f32 %v1130_v21, 0.0  ;;  %v1296_v2 = vmul.f32 2.0, %v1446_v47 }
 0x343   :  { %v1426_v33 = vpack.c.bf16 %v1139_v56, %v1135_v29  ;;  %v1133_v1 = vadd.f32 %v1125_v13, %v1113_v58 }
 0x344   :  { %v1134_v25 = vadd.f32 %v1125_v13, %v1114_v24  ;;  %v1424_v9 = vpack.c.bf16 %v1140_v27, %v1136_v43 }
 0x345   :  { %v1141_v28 = vmax.f32 %v1133_v1, 0.0 }
 0x346   :  { %v1142_v44 = vmax.f32 %v1134_v25, 0.0  ;;  %1425 = vmatprep.subr.bf16.mxu0 %v1424_v9 }
 0x347   :  { %v1430_v51 = vpack.c.bf16 %v1141_v28, %v1137_v63  ;;  %1427 = vmatpush1.bf16.msra.mxu0 %v1426_v33 }
 0x348   :  { %v1428_v49 = vpack.c.bf16 %v1142_v44, %v1138_v12 }
 0x34a   :  { %1350 = vmatmul.mubr.msk.f32.vlgmr.msra.gmra.mrb[8].mxu0 %vm934_vm2, %v1143_v18  ;;  %1429 = vmatprep.subr.bf16.mxu1 %v1428_v49 }
 0x34b   :  { %1431 = vmatpush1.bf16.msra.mxu1 %v1430_v51 }
 0x34e   :  { %1351 = vmatmul.mubr.msk.f32.vlgmr.msra.gmra.mrb[8].mxu1 %vm934_vm2, %v1143_v18 }
 0x41d   :  { %v1219_v59 = vpop.f32.mrb[8].mxu0 }
 0x41e   :  { %v1220_v40 = vadd.f32 %v1219_v59, %v1148_v26  ;;  %v1221_v57 = vpop.f32.mrb[9].mxu0 }
 0x41f   :  { %v1222_v37 = vadd.f32 %v1221_v57, %v1148_v26 }
 0x420   :  { %v1301_v42 = vrot.slane %v1220_v40, 4 }
 0x421   :  { %v1302_v60 = vrot.slane %v1222_v37, 4  ;;  %v1290_v6 = vpop.f32.mrb[8].mxu1 }
 0x422   :  { %v1309_v5 = vadd.f32 %v1301_v42, %v1220_v40  ;;  %v1291_v7 = vadd.f32 %v1290_v6, %v1148_v26  ;;  %v1292_v31 = vpop.f32.mrb[9].mxu1 }
 0x423   :  { %v1310_v23 = vadd.f32 %v1302_v60, %v1222_v37  ;;  %v1293_v32 = vadd.f32 %v1292_v31, %v1148_v26 }
 0x424   :  { %v1313_v4 = vmul.f32 0.25, %v1309_v5  ;;  %v1303_v8 = vrot.slane %v1291_v7, 4 }
 0x425   :  { %v1314_v30 = vmul.f32 0.25, %v1310_v23  ;;  %v1304_v50 = vrot.slane %v1293_v32, 4 }
 0x426   :  { %v1311_v16 = vadd.f32 %v1303_v8, %v1291_v7 }
 0x427   :  { %v1321_v34 = vcombine.low %v1313_v4, %v1314_v30  ;;  %v1312_v61 = vadd.f32 %v1304_v50, %v1293_v32 }
 0x428   :  { %v1315_v38 = vmul.f32 0.25, %v1311_v16 }
 0x429   :  { %v1325_v10 = vadd.f32 %v1321_v34, %v1295_v35  ;;  %v1316_v45 = vmul.f32 0.25, %v1312_v61 }
 0x42b   :  { %1327 = vst [vmem:[%s2134_s12] sm:$0xff] %v1325_v10  ;;  %v1322_v11 = vcombine.low %v1315_v38, %v1316_v45 }
 0x42d   :  { %v1326_v14 = vadd.f32 %v1322_v11, %v1296_v2 }
 0x42f   :  { %1328 = vst [vmem:[%s2134_s12 + $0x8] sm:$0xff] %v1326_v14 }

</bundles_post_ra>
